<compile_context>
chip_gen: v7x
topology: tpu7x:2x2x1
jax: 0.10.0
libtpu: 0.0.40
codegen_flags: <defaults>
</compile_context>

<pallas_src>
import jax
import jax.numpy as jnp
from jax.experimental import pallas as pl
from jax.experimental.pallas import tpu as pltpu


def _mm_cat_kernel_k_tiled(a_ref, b_ref, o_ref, acc_ref):
    # Zero the accumulator on the first K step.
    @pl.when(pl.program_id(2) == 0)
    def _():
        acc_ref[...] = jnp.zeros_like(acc_ref)

    acc_ref[...] += jnp.dot(
        a_ref[...], b_ref[...], preferred_element_type=jnp.float32
    )

    # On the last K step, write the finished tile to BOTH halves of the output
    # (this is the torch.cat([t, t], dim=0)).
    @pl.when(pl.program_id(2) == pl.num_programs(2) - 1)
    def _():
        t = acc_ref[...].astype(o_ref.dtype)
        o_ref[0] = t
        o_ref[1] = t


def _mm_cat_kernel_full_k(a_ref, b_ref, o_ref):
    # Full-K stripes: single dot, no accumulator / init / epilogue needed.
    t = jnp.dot(
        a_ref[...], b_ref[...], preferred_element_type=jnp.float32
    ).astype(o_ref.dtype)
    o_ref[0] = t
    o_ref[1] = t


def _pick_tile(n, preferred):
    for t in preferred:
        if n % t == 0:
            return t
    # n is always a multiple of 128 here (wrapper pads), so this is unreachable
    # in practice; returning the full extent remains a valid block shape.
    return n


_VMEM_LIMIT_BYTES = 32 * 1024 * 1024   # raises v5e's 16 MiB default; matches v6e/v7x default
_FULL_K_VMEM_BUDGET = 26 * 1024 * 1024  # headroom under the 32 MiB scoped limit


def mm_cat(x, *, force_k_tiled=False):
    n, m = x.shape
    assert n == m, "torch.mm(input, input) requires a square matrix"
    orig_n = n

    # Pad to a multiple of 128. Zero padding keeps the top-left NxN block of
    # x_pad @ x_pad equal to x @ x, and guarantees 128-aligned lane-dense tiles.
    n_pad = ((n + 127) // 128) * 128
    if n_pad != n:
        x = jnp.pad(x, ((0, n_pad - n), (0, n_pad - n)))
        n = n_pad

    itemsize = x.dtype.itemsize
    tm = _pick_tile(n, (512, 256, 128))
    tn = tm

    # Estimated VMEM of the K-collapsed path: double-buffered input stripes +
    # double-buffered (2, tm, tn) output block.
    full_k_vmem = 2 * (tm * n + n * tn) * itemsize + 2 * 2 * tm * tn * itemsize
    use_full_k = (not force_k_tiled) and (full_k_vmem <= _FULL_K_VMEM_BUDGET)

    if use_full_k:
        grid = (n // tm, n // tn)
        in_specs = [
            # lhs stripe: same block index for every j -> DMA'd once per i, reused.
            pl.BlockSpec((tm, n), lambda i, j: (i, 0)),
            pl.BlockSpec((n, tn), lambda i, j: (0, j)),
        ]
        out_specs = pl.BlockSpec((2, tm, tn), lambda i, j: (0, i, j))
        kernel = _mm_cat_kernel_full_k
        scratch_shapes = []
        dims = ("parallel", "arbitrary")
        read_bytes = (1 + n // tm) * n * n * itemsize
    else:
        tk = _pick_tile(n, (256, 128))
        grid = (n // tm, n // tn, n // tk)
        in_specs = [
            pl.BlockSpec((tm, tk), lambda i, j, k: (i, k)),
            pl.BlockSpec((tk, tn), lambda i, j, k: (k, j)),
        ]
        out_specs = pl.BlockSpec((2, tm, tn), lambda i, j, k: (0, i, j))
        kernel = _mm_cat_kernel_k_tiled
        scratch_shapes = [pltpu.VMEM((tm, tn), jnp.float32)]
        dims = ("parallel", "parallel", "arbitrary")
        read_bytes = (n // tm + n // tn) * n * n * itemsize

    cost = pl.CostEstimate(
        flops=2 * n * n * n,
        transcendentals=0,
        bytes_accessed=read_bytes + 2 * n * n * itemsize,
    )

    out3 = pl.pallas_call(
        kernel,
        out_shape=jax.ShapeDtypeStruct((2, n, n), x.dtype),
        grid_spec=pltpu.PrefetchScalarGridSpec(
            num_scalar_prefetch=0,
            grid=grid,
            in_specs=in_specs,
            out_specs=out_specs,
            scratch_shapes=scratch_shapes,
        ),
        compiler_params=pltpu.CompilerParams(
            dimension_semantics=dims,
            vmem_limit_bytes=_VMEM_LIMIT_BYTES,
        ),
        cost_estimate=cost,
    )(x, x)

    if orig_n != n:
        out3 = out3[:, :orig_n, :orig_n]
    # (2, N, N) -> (2N, N): identical row-major bytes, free relabel == cat([t, t], 0).
    return out3.reshape(2 * orig_n, orig_n)


if __name__ == "__main__":
    # torch.mm(input, input) requires a square matrix, so the reference (3, 4)
    # example is replaced by small square shapes. Cases exercise:
    #   N=256 : single-block K-collapsed path
    #   N=384 : multi-block K-collapsed path (128 tiles, lhs reuse across j)
    #   N=200 : non-128-multiple -> zero-padding path
    #   N=512 (forced) : K-tiled accumulator path (tk=256, 2 K-steps)
    key = jax.random.PRNGKey(0)
    cases = [(256, False), (384, False), (200, False), (512, True)]
    for n, force in cases:
        k, key = jax.random.split(key)
        x = jax.random.normal(k, (n, n), dtype=jnp.float32)
        out = jax.block_until_ready(mm_cat(x, force_k_tiled=force))

        t_ref = x @ x
        ref = jnp.concatenate([t_ref, t_ref], axis=0)
        assert out.shape == (2 * n, n), (out.shape, n)
        assert jnp.allclose(out, ref, atol=1e-3, rtol=1e-3), f"mismatch at N={n}"

    print("KERNEL_OK")
</pallas_src>

<mosaic_0001>
module attributes {stable_mosaic.version = 11 : i64} {
  func.func @_mm_cat_kernel_full_k(%arg0: i32, %arg1: i32, %arg2: memref<256x256xf32, #tpu.memory_space<vmem>>, %arg3: memref<256x256xf32, #tpu.memory_space<vmem>>, %arg4: memref<2x256x256xf32, #tpu.memory_space<vmem>>) attributes {dimension_semantics = [#tpu.dimension_semantics<parallel>, #tpu.dimension_semantics<arbitrary>], iteration_bounds = array<i64: 1, 1>, scalar_prefetch = 0 : i64, scratch_operands = 0 : i64, tpu.core_type = #tpu.core_type<tc>, window_params = [{transform_indices = @transform_0, window_bounds = array<i64: 256, 256>}, {transform_indices = @transform_1, window_bounds = array<i64: 256, 256>}, {transform_indices = @transform_2, window_bounds = array<i64: 2, 256, 256>}]} {
    %c0 = arith.constant 0 : index
    %c0_0 = arith.constant 0 : index
    %0 = vector.load %arg2[%c0, %c0_0] : memref<256x256xf32, #tpu.memory_space<vmem>>, vector<256x256xf32>
    %c0_1 = arith.constant 0 : index
    %c0_2 = arith.constant 0 : index
    %1 = vector.load %arg3[%c0_1, %c0_2] : memref<256x256xf32, #tpu.memory_space<vmem>>, vector<256x256xf32>
    %cst = arith.constant dense<0.000000e+00> : vector<256x256xf32>
    %2 = tpu.matmul %0, %1, %cst {dimension_numbers = #tpu.dot_dimension_numbers<[1], [0], [0], [1], [0, 0, 1, 1], [], []>} : vector<256x256xf32>, vector<256x256xf32>, vector<256x256xf32> -> vector<256x256xf32>
    %c0_3 = arith.constant 0 : index
    %c0_4 = arith.constant 0 : index
    %c0_5 = arith.constant 0 : index
    %3 = vector.load %arg4[%c0_3, %c0_4, %c0_5] : memref<2x256x256xf32, #tpu.memory_space<vmem>>, vector<1x256x256xf32>
    %4 = vector.shape_cast %3 : vector<1x256x256xf32> to vector<256x256xf32>
    %5 = vector.shape_cast %2 : vector<256x256xf32> to vector<1x256x256xf32>
    tpu.vector_store %arg4[%c0_3, %c0_4, %c0_5], %5 {strides = array<i32>} : memref<2x256x256xf32, #tpu.memory_space<vmem>>, vector<1x256x256xf32>,
    %c1 = arith.constant 1 : index
    %c0_6 = arith.constant 0 : index
    %c0_7 = arith.constant 0 : index
    %6 = vector.load %arg4[%c1, %c0_6, %c0_7] : memref<2x256x256xf32, #tpu.memory_space<vmem>>, vector<1x256x256xf32>
    %7 = vector.shape_cast %6 : vector<1x256x256xf32> to vector<256x256xf32>
    %8 = vector.shape_cast %2 : vector<256x256xf32> to vector<1x256x256xf32>
    tpu.vector_store %arg4[%c1, %c0_6, %c0_7], %8 {strides = array<i32>} : memref<2x256x256xf32, #tpu.memory_space<vmem>>, vector<1x256x256xf32>,
    return
  }
  func.func @transform_0(%arg0: i32, %arg1: i32) -> (i32, i32) {
    %c0_i32 = arith.constant 0 : i32
    %c0_i32_0 = arith.constant 0 : i32
    return %arg0, %c0_i32 : i32, i32
  }
  func.func @transform_1(%arg0: i32, %arg1: i32) -> (i32, i32) {
    %c0_i32 = arith.constant 0 : i32
    %c0_i32_0 = arith.constant 0 : i32
    return %c0_i32, %arg1 : i32, i32
  }
  func.func @transform_2(%arg0: i32, %arg1: i32) -> (i32, i32, i32) {
    %c0_i32 = arith.constant 0 : i32
    %c0_i32_0 = arith.constant 0 : i32
    return %c0_i32, %arg0, %arg1 : i32, i32, i32
  }
}

</mosaic_0001>

<bundles_post_ra>
// kernel: tpu_custom_call.1
= control target key start
LH: loop header
LB: loop body
LE: loop exit
PB: predicated region body
PF: predicated region fallthrough
CT: control target
= control target key end

     0   :  { %7 = vsyncpa [#allocation3], 0  ;;  %s810_s0 = inlined_call_operand.hbm [shape: f32[256,256], index: 0, kind: input, shape index: {}]   ;;  %s811_s1 = inlined_call_operand.hbm [shape: f32[256,256], index: 1, kind: input, shape index: {}]   ;;  %s812_s2 = inlined_call_operand.hbm [shape: f32[2,256,256], index: 2, kind: output, shape index: {}]  }
   0x1   :  { %8 = vsyncpa [#allocation6], 0 }
   0x2   :  { %9 = vsyncpa [#allocation4], 0  ;;  %s745_s9 = smov [#allocation2]   ;;  %s673_s13 = scalar_lea.hbm %s810_s0, 8192 }
   0x3   :  { %s15_s10 = sshll.u32 %s745_s9, 4  ;;  %p674_p0 = scmp.ne.s32.totalorder %s810_s0, %s673_s13  ;;  %s16_s10 = int_to_ptr.vmem [resolvable:$true] %s15_s10 }
   0x4   :  { %p677_p1 = scmp.lt.u32.totalorder %s673_s13, %s810_s0 }
   0x6   :  { %p679_p2 = pnand %p677_p1, %p674_p0 }
   0x8   :  { %682 = shalt.err (!%p679_p2)
}
   0x9   :  { %s683_s18 = scalar_lea.vmem %s16_s10, 8192  ;;  %p688_p4 = scmp.lt.s32.totalorder %s16_s10, %s16_s10 }
   0xa   :  { %p684_p3 = scmp.ne.s32.totalorder %s16_s10, %s683_s18  ;;  %p689_p5 = scmp.lt.s32.totalorder %s683_s18, %s683_s18 }
   0xc   :  { %p690_p6 = por %p689_p5, %p688_p4 }
   0xe   :  { %p691_p7 = pnand %p690_p6, %p684_p3 }
  0x10   :  { %694 = shalt.err (!%p691_p7)
}
  0x11   :  { %s746_s19 = smov 256   ;;  %s747_s20 = smov 16  }
  0x12   :  { %21 = dma.hbm_to_vmem [thread:$0]  %s810_s0, 8192, %s16_s10, [#allocation3], %s746_s19, %s746_s19, %s747_s20  }
  0x13   :  { %s748_s23 = smov [#allocation5]   ;;  %s695_s27 = scalar_lea.hbm %s811_s1, 8192 }
  0x14   :  { %s27_s24 = sshll.u32 %s748_s23, 4  ;;  %p696_p8 = scmp.ne.s32.totalorder %s811_s1, %s695_s27  ;;  %s28_s24 = int_to_ptr.vmem [resolvable:$true] %s27_s24 }
  0x15   :  { %p699_p9 = scmp.lt.u32.totalorder %s695_s27, %s811_s1 }
  0x17   :  { %p701_p10 = pnand %p699_p9, %p696_p8 }
  0x19   :  { %704 = shalt.err (!%p701_p10)
}
  0x1a   :  { %s705_s4 = scalar_lea.vmem %s28_s24, 8192  ;;  %p710_p12 = scmp.lt.s32.totalorder %s28_s24, %s28_s24 }
  0x1b   :  { %p706_p11 = scmp.ne.s32.totalorder %s28_s24, %s705_s4  ;;  %p711_p13 = scmp.lt.s32.totalorder %s705_s4, %s705_s4 }
  0x1d   :  { %p712_p0 = por %p711_p13, %p710_p12 }
  0x1f   :  { %p713_p1 = pnand %p712_p0, %p706_p11 }
  0x21   :  { %716 = shalt.err (!%p713_p1)
}
  0x22   :  { %33 = dma.hbm_to_vmem [thread:$0]  %s811_s1, 8192, %s28_s24, [#allocation6], %s746_s19, %s746_s19, %s747_s20  }
  0x23   :  { %739 = dma.done.wait [#allocation3], 8192  }
  0x24   :  { %740 = vsyncadd [#allocation3], 4294959104 }
  0x25   :  { %741 = dma.done.wait [#allocation6], 8192  }
  0x26   :  { %742 = vsyncadd [#allocation6], 4294959104  ;;  %v105_v0 = vld [vmem:[#allocation5 + $0x8] sm:$0xff]  ;;  %v107_v1 = vld [vmem:[#allocation5 + $0x18] sm:$0xff]  ;;  %s749_s1 = smov [#allocation7]  }
  0x27   :  { %v104_v2 = vld [vmem:[#allocation5] sm:$0xff]  ;;  %v572_v3 = vpack.c.bf16 %v107_v1, %v105_v0  ;;  %v106_v4 = vld [vmem:[#allocation5 + $0x10] sm:$0xff]  ;;  %v109_v5 = vld [vmem:[#allocation5 + $0x28] sm:$0xff]  ;;  %s559_s6 = sshll.u32 %s749_s1, 4  ;;  %s560_s6 = int_to_ptr.vmem [resolvable:$true] %s559_s6 }
  0x28   :  { %v111_v6 = vld [vmem:[#allocation5 + $0x38] sm:$0xff]  ;;  %v574_v7 = vpack.c.bf16 %v106_v4, %v104_v2  ;;  %v108_v9 = vld [vmem:[#allocation5 + $0x20] sm:$0xff]  ;;  %v110_v10 = vld [vmem:[#allocation5 + $0x30] sm:$0xff]  ;;  %s717_s7 = scalar_lea.vmem %s560_s6, 16384  ;;  %p722_p3 = scmp.lt.s32.totalorder %s560_s6, %s560_s6 }
  0x29   :  { %v576_v8 = vpack.c.bf16 %v111_v6, %v109_v5  ;;  %v113_v11 = vld [vmem:[#allocation5 + $0x48] sm:$0xff]  ;;  %573 = vmatprep.subr.bf16.mxu0 %v572_v3  ;;  %636 = vmatprep.subr.bf16.mxu1 %v572_v3  ;;  %v115_v12 = vld [vmem:[#allocation5 + $0x58] sm:$0xff]  ;;  %v578_v13 = vpack.c.bf16 %v110_v10, %v108_v9  ;;  %v112_v15 = vld [vmem:[#allocation5 + $0x40] sm:$0xff]  ;;  %p718_p2 = scmp.ne.s32.totalorder %s560_s6, %s717_s7  ;;  %p723_p4 = scmp.lt.s32.totalorder %s717_s7, %s717_s7 }
  0x2a   :  { %575 = vmatpush1.bf16.msra.mxu0 %v574_v7  ;;  %652 = vmatpush1.bf16.msra.mxu1 %v574_v7  ;;  %v580_v14 = vpack.c.bf16 %v115_v12, %v113_v11  ;;  %v114_v16 = vld [vmem:[#allocation5 + $0x50] sm:$0xff]  ;;  %v117_v17 = vld [vmem:[#allocation5 + $0x68] sm:$0xff]  ;;  %v119_v18 = vld [vmem:[#allocation5 + $0x78] sm:$0xff] }
  0x2b   :  { %577 = vmatprep.subr.bf16.mxu0 %v576_v8  ;;  %637 = vmatprep.subr.bf16.mxu1 %v576_v8  ;;  %v582_v19 = vpack.c.bf16 %v114_v16, %v112_v15  ;;  %v584_v20 = vpack.c.bf16 %v119_v18, %v117_v17  ;;  %v116_v21 = vld [vmem:[#allocation5 + $0x60] sm:$0xff]  ;;  %v118_v22 = vld [vmem:[#allocation5 + $0x70] sm:$0xff]  ;;  %v121_v23 = vld [vmem:[#allocation5 + $0x88] sm:$0xff]  ;;  %p724_p5 = por %p723_p4, %p722_p3 }
  0x2c   :  { %v123_v24 = vld [vmem:[#allocation5 + $0x98] sm:$0xff]  ;;  %v586_v25 = vpack.c.bf16 %v118_v22, %v116_v21  ;;  %v120_v27 = vld [vmem:[#allocation5 + $0x80] sm:$0xff]  ;;  %v122_v28 = vld [vmem:[#allocation5 + $0x90] sm:$0xff] }
  0x2d   :  { %v588_v26 = vpack.c.bf16 %v123_v24, %v121_v23  ;;  %v125_v29 = vld [vmem:[#allocation5 + $0xa8] sm:$0xff]  ;;  %v127_v30 = vld [vmem:[#allocation5 + $0xb8] sm:$0xff]  ;;  %v590_v31 = vpack.c.bf16 %v122_v28, %v120_v27  ;;  %v124_v33 = vld [vmem:[#allocation5 + $0xa0] sm:$0xff]  ;;  %p725_p6 = pnand %p724_p5, %p718_p2 }
  0x2e   :  { %579 = vmatpush1.bf16.msra.mxu0 %v578_v13  ;;  %653 = vmatpush1.bf16.msra.mxu1 %v578_v13  ;;  %v592_v32 = vpack.c.bf16 %v127_v30, %v125_v29  ;;  %v126_v34 = vld [vmem:[#allocation5 + $0xb0] sm:$0xff]  ;;  %v129_v35 = vld [vmem:[#allocation5 + $0xc8] sm:$0xff]  ;;  %v131_v36 = vld [vmem:[#allocation5 + $0xd8] sm:$0xff] }
  0x2f   :  { %581 = vmatprep.subr.bf16.mxu0 %v580_v14  ;;  %638 = vmatprep.subr.bf16.mxu1 %v580_v14  ;;  %v594_v37 = vpack.c.bf16 %v126_v34, %v124_v33  ;;  %v128_v38 = vld [vmem:[#allocation5 + $0xc0] sm:$0xff]  ;;  %v596_v39 = vpack.c.bf16 %v131_v36, %v129_v35  ;;  %v130_v40 = vld [vmem:[#allocation5 + $0xd0] sm:$0xff]  ;;  %v41_v41 = vld [vmem:[#allocation2 + $0x8] sm:$0xff] }
  0x30   :  { %v73_v42 = vld [vmem:[#allocation2 + $0x108] sm:$0xff]  ;;  %v135_v44 = vld [vmem:[#allocation5 + $0xf8] sm:$0xff]  ;;  %232 = vmatprep.mubr.f32.mxu0 %v41_v41  ;;  %v598_v45 = vpack.c.bf16 %v130_v40, %v128_v38  ;;  %v132_v47 = vld [vmem:[#allocation5 + $0xe0] sm:$0xff] }
  0x31   :  { %v133_v43 = vld [vmem:[#allocation5 + $0xe8] sm:$0xff]  ;;  %328 = vmatprep.mubr.f32.mxu1 %v73_v42  ;;  %v134_v48 = vld [vmem:[#allocation5 + $0xf0] sm:$0xff]  ;;  %v139_v50 = vld [vmem:[#allocation5 + $0x118] sm:$0xff] }
  0x32   :  { %583 = vmatpush1.bf16.msra.mxu0 %v582_v19  ;;  %654 = vmatpush1.bf16.msra.mxu1 %v582_v19  ;;  %v600_v46 = vpack.c.bf16 %v135_v44, %v133_v43  ;;  %v137_v49 = vld [vmem:[#allocation5 + $0x108] sm:$0xff]  ;;  %v602_v51 = vpack.c.bf16 %v134_v48, %v132_v47  ;;  %v136_v53 = vld [vmem:[#allocation5 + $0x100] sm:$0xff]  ;;  %v138_v54 = vld [vmem:[#allocation5 + $0x110] sm:$0xff] }
  0x33   :  { %585 = vmatprep.subr.bf16.mxu0 %v584_v20  ;;  %639 = vmatprep.subr.bf16.mxu1 %v584_v20  ;;  %v604_v52 = vpack.c.bf16 %v139_v50, %v137_v49  ;;  %v141_v55 = vld [vmem:[#allocation5 + $0x128] sm:$0xff]  ;;  %v143_v56 = vld [vmem:[#allocation5 + $0x138] sm:$0xff]  ;;  %v606_v57 = vpack.c.bf16 %v138_v54, %v136_v53  ;;  %v140_v59 = vld [vmem:[#allocation5 + $0x120] sm:$0xff] }
  0x34   :  { %v608_v58 = vpack.c.bf16 %v143_v56, %v141_v55  ;;  %v142_v60 = vld [vmem:[#allocation5 + $0x130] sm:$0xff]  ;;  %v145_v61 = vld [vmem:[#allocation5 + $0x148] sm:$0xff]  ;;  %v147_v62 = vld [vmem:[#allocation5 + $0x158] sm:$0xff] }
  0x35   :  { %v610_v63 = vpack.c.bf16 %v142_v60, %v140_v59  ;;  %v612_v0 = vpack.c.bf16 %v147_v62, %v145_v61  ;;  %v144_v1 = vld [vmem:[#allocation5 + $0x140] sm:$0xff]  ;;  %v146_v2 = vld [vmem:[#allocation5 + $0x150] sm:$0xff]  ;;  %v149_v3 = vld [vmem:[#allocation5 + $0x168] sm:$0xff] }
  0x36   :  { %587 = vmatpush1.bf16.msra.mxu0 %v586_v25  ;;  %655 = vmatpush1.bf16.msra.mxu1 %v586_v25  ;;  %v151_v4 = vld [vmem:[#allocation5 + $0x178] sm:$0xff]  ;;  %v614_v5 = vpack.c.bf16 %v146_v2, %v144_v1  ;;  %v148_v7 = vld [vmem:[#allocation5 + $0x160] sm:$0xff]  ;;  %v150_v8 = vld [vmem:[#allocation5 + $0x170] sm:$0xff] }
  0x37   :  { %589 = vmatprep.subr.bf16.mxu0 %v588_v26  ;;  %640 = vmatprep.subr.bf16.mxu1 %v588_v26  ;;  %v616_v6 = vpack.c.bf16 %v151_v4, %v149_v3  ;;  %v153_v9 = vld [vmem:[#allocation5 + $0x188] sm:$0xff]  ;;  %v155_v10 = vld [vmem:[#allocation5 + $0x198] sm:$0xff]  ;;  %v618_v11 = vpack.c.bf16 %v150_v8, %v148_v7  ;;  %v152_v13 = vld [vmem:[#allocation5 + $0x180] sm:$0xff] }
  0x38   :  { %v620_v12 = vpack.c.bf16 %v155_v10, %v153_v9  ;;  %v154_v14 = vld [vmem:[#allocation5 + $0x190] sm:$0xff]  ;;  %v157_v15 = vld [vmem:[#allocation5 + $0x1a8] sm:$0xff]  ;;  %v159_v16 = vld [vmem:[#allocation5 + $0x1b8] sm:$0xff] }
  0x39   :  { %v622_v17 = vpack.c.bf16 %v154_v14, %v152_v13  ;;  %v624_v18 = vpack.c.bf16 %v159_v16, %v157_v15  ;;  %v156_v19 = vld [vmem:[#allocation5 + $0x1a0] sm:$0xff]  ;;  %v158_v20 = vld [vmem:[#allocation5 + $0x1b0] sm:$0xff]  ;;  %v161_v21 = vld [vmem:[#allocation5 + $0x1c8] sm:$0xff] }
  0x3a   :  { %591 = vmatpush1.bf16.msra.mxu0 %v590_v31  ;;  %656 = vmatpush1.bf16.msra.mxu1 %v590_v31  ;;  %v163_v22 = vld [vmem:[#allocation5 + $0x1d8] sm:$0xff]  ;;  %v626_v23 = vpack.c.bf16 %v158_v20, %v156_v19  ;;  %v160_v25 = vld [vmem:[#allocation5 + $0x1c0] sm:$0xff]  ;;  %v162_v26 = vld [vmem:[#allocation5 + $0x1d0] sm:$0xff] }
  0x3b   :  { %593 = vmatprep.subr.bf16.mxu0 %v592_v32  ;;  %641 = vmatprep.subr.bf16.mxu1 %v592_v32  ;;  %v628_v24 = vpack.c.bf16 %v163_v22, %v161_v21  ;;  %v165_v27 = vld [vmem:[#allocation5 + $0x1e8] sm:$0xff]  ;;  %v167_v28 = vld [vmem:[#allocation5 + $0x1f8] sm:$0xff]  ;;  %v630_v29 = vpack.c.bf16 %v162_v26, %v160_v25  ;;  %v164_v31 = vld [vmem:[#allocation5 + $0x1e0] sm:$0xff] }
  0x3c   :  { %v632_v30 = vpack.c.bf16 %v167_v28, %v165_v27  ;;  %v166_v32 = vld [vmem:[#allocation5 + $0x1f0] sm:$0xff]  ;;  %v40_v34 = vld [vmem:[#allocation2] sm:$0xff]  ;;  %v43_v36 = vld [vmem:[#allocation2 + $0x18] sm:$0xff] }
  0x3d   :  { %v634_v33 = vpack.c.bf16 %v166_v32, %v164_v31  ;;  %v72_v35 = vld [vmem:[#allocation2 + $0x100] sm:$0xff]  ;;  %v42_v38 = vld [vmem:[#allocation2 + $0x10] sm:$0xff]  ;;  %v45_v40 = vld [vmem:[#allocation2 + $0x28] sm:$0xff] }
  0x3e   :  { %595 = vmatpush1.bf16.msra.mxu0 %v594_v37  ;;  %657 = vmatpush1.bf16.msra.mxu1 %v594_v37  ;;  %v75_v37 = vld [vmem:[#allocation2 + $0x118] sm:$0xff]  ;;  %v77_v41 = vld [vmem:[#allocation2 + $0x128] sm:$0xff]  ;;  %v44_v42 = vld [vmem:[#allocation2 + $0x20] sm:$0xff] }
  0x3f   :  { %597 = vmatprep.subr.bf16.mxu0 %v596_v39  ;;  %642 = vmatprep.subr.bf16.mxu1 %v596_v39  ;;  %v74_v39 = vld [vmem:[#allocation2 + $0x110] sm:$0xff]  ;;  %v76_v43 = vld [vmem:[#allocation2 + $0x120] sm:$0xff]  ;;  %v47_v44 = vld [vmem:[#allocation2 + $0x38] sm:$0xff] }
  0x40   :  { %v78_v47 = vld [vmem:[#allocation2 + $0x130] sm:$0xff]  ;;  %v49_v48 = vld [vmem:[#allocation2 + $0x48] sm:$0xff]  ;;  %v48_v50 = vld [vmem:[#allocation2 + $0x40] sm:$0xff] }
  0x41   :  { %v81_v49 = vld [vmem:[#allocation2 + $0x148] sm:$0xff]  ;;  %v83_v53 = vld [vmem:[#allocation2 + $0x158] sm:$0xff]  ;;  %v50_v54 = vld [vmem:[#allocation2 + $0x50] sm:$0xff] }
  0x42   :  { %599 = vmatpush1.bf16.msra.mxu0 %v598_v45  ;;  %658 = vmatpush1.bf16.msra.mxu1 %v598_v45  ;;  %v79_v45 = vld [vmem:[#allocation2 + $0x138] sm:$0xff]  ;;  %v82_v55 = vld [vmem:[#allocation2 + $0x150] sm:$0xff]  ;;  %v53_v56 = vld [vmem:[#allocation2 + $0x68] sm:$0xff] }
  0x43   :  { %601 = vmatprep.subr.bf16.mxu0 %v600_v46  ;;  %643 = vmatprep.subr.bf16.mxu1 %v600_v46  ;;  %v46_v46 = vld [vmem:[#allocation2 + $0x30] sm:$0xff]  ;;  %v84_v59 = vld [vmem:[#allocation2 + $0x160] sm:$0xff]  ;;  %v55_v60 = vld [vmem:[#allocation2 + $0x78] sm:$0xff] }
  0x44   :  { %v87_v61 = vld [vmem:[#allocation2 + $0x178] sm:$0xff]  ;;  %v54_v62 = vld [vmem:[#allocation2 + $0x70] sm:$0xff]  ;;  %v89_v1 = vld [vmem:[#allocation2 + $0x188] sm:$0xff] }
  0x45   :  { %v56_v2 = vld [vmem:[#allocation2 + $0x80] sm:$0xff]  ;;  %v59_v4 = vld [vmem:[#allocation2 + $0x98] sm:$0xff]  ;;  %v90_v7 = vld [vmem:[#allocation2 + $0x190] sm:$0xff] }
  0x46   :  { %603 = vmatpush1.bf16.msra.mxu0 %v602_v51  ;;  %659 = vmatpush1.bf16.msra.mxu1 %v602_v51  ;;  %v80_v51 = vld [vmem:[#allocation2 + $0x140] sm:$0xff]  ;;  %v61_v8 = vld [vmem:[#allocation2 + $0xa8] sm:$0xff]  ;;  %v95_v13 = vld [vmem:[#allocation2 + $0x1b8] sm:$0xff] }
  0x47   :  { %605 = vmatprep.subr.bf16.mxu0 %v604_v52  ;;  %644 = vmatprep.subr.bf16.mxu1 %v604_v52  ;;  %v51_v52 = vld [vmem:[#allocation2 + $0x58] sm:$0xff]  ;;  %v88_v3 = vld [vmem:[#allocation2 + $0x180] sm:$0xff]  ;;  %v93_v9 = vld [vmem:[#allocation2 + $0x1a8] sm:$0xff] }
  0x48   :  { %v60_v10 = vld [vmem:[#allocation2 + $0xa0] sm:$0xff]  ;;  %v62_v14 = vld [vmem:[#allocation2 + $0xb0] sm:$0xff]  ;;  %v65_v16 = vld [vmem:[#allocation2 + $0xc8] sm:$0xff] }
  0x49   :  { %v94_v15 = vld [vmem:[#allocation2 + $0x1b0] sm:$0xff]  ;;  %v96_v19 = vld [vmem:[#allocation2 + $0x1c0] sm:$0xff]  ;;  %v67_v20 = vld [vmem:[#allocation2 + $0xd8] sm:$0xff] }
  0x4a   :  { %607 = vmatpush1.bf16.msra.mxu0 %v606_v57  ;;  %660 = vmatpush1.bf16.msra.mxu1 %v606_v57  ;;  %v85_v57 = vld [vmem:[#allocation2 + $0x168] sm:$0xff]  ;;  %v99_v21 = vld [vmem:[#allocation2 + $0x1d8] sm:$0xff]  ;;  %v66_v22 = vld [vmem:[#allocation2 + $0xd0] sm:$0xff] }
  0x4b   :  { %609 = vmatprep.subr.bf16.mxu0 %v608_v58  ;;  %645 = vmatprep.subr.bf16.mxu1 %v608_v58  ;;  %v52_v58 = vld [vmem:[#allocation2 + $0x60] sm:$0xff]  ;;  %v101_v25 = vld [vmem:[#allocation2 + $0x1e8] sm:$0xff]  ;;  %v71_v28 = vld [vmem:[#allocation2 + $0xf8] sm:$0xff] }
  0x4c   :  { %v68_v26 = vld [vmem:[#allocation2 + $0xe0] sm:$0xff]  ;;  %v102_v31 = vld [vmem:[#allocation2 + $0x1f0] sm:$0xff] }
  0x4d   :  { %v100_v27 = vld [vmem:[#allocation2 + $0x1e0] sm:$0xff] }
  0x4e   :  { %611 = vmatpush1.bf16.msra.mxu0 %v610_v63  ;;  %661 = vmatpush1.bf16.msra.mxu1 %v610_v63  ;;  %v86_v63 = vld [vmem:[#allocation2 + $0x170] sm:$0xff] }
  0x4f   :  { %613 = vmatprep.subr.bf16.mxu0 %v612_v0  ;;  %646 = vmatprep.subr.bf16.mxu1 %v612_v0  ;;  %v57_v0 = vld [vmem:[#allocation2 + $0x88] sm:$0xff] }
  0x52   :  { %615 = vmatpush1.bf16.msra.mxu0 %v614_v5  ;;  %662 = vmatpush1.bf16.msra.mxu1 %v614_v5  ;;  %v91_v5 = vld [vmem:[#allocation2 + $0x198] sm:$0xff] }
  0x53   :  { %617 = vmatprep.subr.bf16.mxu0 %v616_v6  ;;  %647 = vmatprep.subr.bf16.mxu1 %v616_v6  ;;  %v58_v6 = vld [vmem:[#allocation2 + $0x90] sm:$0xff] }
  0x56   :  { %619 = vmatpush1.bf16.msra.mxu0 %v618_v11  ;;  %663 = vmatpush1.bf16.msra.mxu1 %v618_v11  ;;  %v92_v11 = vld [vmem:[#allocation2 + $0x1a0] sm:$0xff] }
  0x57   :  { %621 = vmatprep.subr.bf16.mxu0 %v620_v12  ;;  %648 = vmatprep.subr.bf16.mxu1 %v620_v12  ;;  %v63_v12 = vld [vmem:[#allocation2 + $0xb8] sm:$0xff] }
  0x5a   :  { %623 = vmatpush1.bf16.msra.mxu0 %v622_v17  ;;  %664 = vmatpush1.bf16.msra.mxu1 %v622_v17  ;;  %v97_v17 = vld [vmem:[#allocation2 + $0x1c8] sm:$0xff] }
  0x5b   :  { %625 = vmatprep.subr.bf16.mxu0 %v624_v18  ;;  %649 = vmatprep.subr.bf16.mxu1 %v624_v18  ;;  %v64_v18 = vld [vmem:[#allocation2 + $0xc0] sm:$0xff] }
  0x5e   :  { %627 = vmatpush1.bf16.msra.mxu0 %v626_v23  ;;  %665 = vmatpush1.bf16.msra.mxu1 %v626_v23  ;;  %v98_v23 = vld [vmem:[#allocation2 + $0x1d0] sm:$0xff] }
  0x5f   :  { %629 = vmatprep.subr.bf16.mxu0 %v628_v24  ;;  %650 = vmatprep.subr.bf16.mxu1 %v628_v24  ;;  %v69_v24 = vld [vmem:[#allocation2 + $0xe8] sm:$0xff] }
  0x62   :  { %631 = vmatpush1.bf16.msra.mxu0 %v630_v29  ;;  %666 = vmatpush1.bf16.msra.mxu1 %v630_v29  ;;  %v103_v29 = vld [vmem:[#allocation2 + $0x1f8] sm:$0xff] }
  0x63   :  { %633 = vmatprep.subr.bf16.mxu0 %v632_v30  ;;  %651 = vmatprep.subr.bf16.mxu1 %v632_v30  ;;  %v70_v30 = vld [vmem:[#allocation2 + $0xf0] sm:$0xff] }
  0x66   :  { %635 = vmatpush1.bf16.msra.mxu0 %v634_v33  ;;  %667 = vmatpush1.bf16.msra.mxu1 %v634_v33 }
  0x69   :  { %233 = vmatmul.mubr.f32.vlgmr.msra.gmra.mrb[0].mxu0 %v40_v34  ;;  %329 = vmatmul.mubr.f32.vlgmr.msra.gmra.mrb[0].mxu1 %v72_v35 }
  0x6a   :  { %238 = vmatprep.mubr.f32.mxu0 %v43_v36  ;;  %334 = vmatprep.mubr.f32.mxu1 %v75_v37 }
  0x6d   :  { %239 = vmatmul.mubr.f32.gmra.mrb[2].mxu0 %v42_v38  ;;  %335 = vmatmul.mubr.f32.gmra.mrb[2].mxu1 %v74_v39 }
  0x6e   :  { %244 = vmatprep.mubr.f32.mxu0 %v45_v40  ;;  %340 = vmatprep.mubr.f32.mxu1 %v77_v41 }
  0x71   :  { %245 = vmatmul.mubr.f32.gmra.mrb[4].mxu0 %v44_v42  ;;  %341 = vmatmul.mubr.f32.gmra.mrb[4].mxu1 %v76_v43 }
  0x72   :  { %250 = vmatprep.mubr.f32.mxu0 %v47_v44  ;;  %346 = vmatprep.mubr.f32.mxu1 %v79_v45 }
  0x75   :  { %251 = vmatmul.mubr.f32.gmra.mrb[6].mxu0 %v46_v46  ;;  %347 = vmatmul.mubr.f32.gmra.mrb[6].mxu1 %v78_v47 }
  0x76   :  { %256 = vmatprep.mubr.f32.mxu0 %v49_v48  ;;  %352 = vmatprep.mubr.f32.mxu1 %v81_v49 }
  0x79   :  { %257 = vmatmul.mubr.f32.gmra.mrb[8].mxu0 %v48_v50  ;;  %353 = vmatmul.mubr.f32.gmra.mrb[8].mxu1 %v80_v51 }
  0x7a   :  { %262 = vmatprep.mubr.f32.mxu0 %v51_v52  ;;  %358 = vmatprep.mubr.f32.mxu1 %v83_v53 }
  0x7d   :  { %263 = vmatmul.mubr.f32.gmra.mrb[10].mxu0 %v50_v54  ;;  %359 = vmatmul.mubr.f32.gmra.mrb[10].mxu1 %v82_v55 }
  0x7e   :  { %268 = vmatprep.mubr.f32.mxu0 %v53_v56  ;;  %364 = vmatprep.mubr.f32.mxu1 %v85_v57 }
  0x81   :  { %269 = vmatmul.mubr.f32.gmra.mrb[12].mxu0 %v52_v58  ;;  %365 = vmatmul.mubr.f32.gmra.mrb[12].mxu1 %v84_v59 }
  0x82   :  { %274 = vmatprep.mubr.f32.mxu0 %v55_v60  ;;  %370 = vmatprep.mubr.f32.mxu1 %v87_v61 }
  0x85   :  { %275 = vmatmul.mubr.f32.gmra.mrb[14].mxu0 %v54_v62  ;;  %371 = vmatmul.mubr.f32.gmra.mrb[14].mxu1 %v86_v63 }
  0x86   :  { %280 = vmatprep.mubr.f32.mxu0 %v57_v0  ;;  %376 = vmatprep.mubr.f32.mxu1 %v89_v1 }
  0x89   :  { %281 = vmatmul.mubr.f32.gmra.mrb[16].mxu0 %v56_v2  ;;  %377 = vmatmul.mubr.f32.gmra.mrb[16].mxu1 %v88_v3 }
  0x8a   :  { %286 = vmatprep.mubr.f32.mxu0 %v59_v4  ;;  %382 = vmatprep.mubr.f32.mxu1 %v91_v5 }
  0x8d   :  { %287 = vmatmul.mubr.f32.gmra.mrb[18].mxu0 %v58_v6  ;;  %383 = vmatmul.mubr.f32.gmra.mrb[18].mxu1 %v90_v7 }
  0x8e   :  { %292 = vmatprep.mubr.f32.mxu0 %v61_v8  ;;  %388 = vmatprep.mubr.f32.mxu1 %v93_v9 }
  0x91   :  { %293 = vmatmul.mubr.f32.gmra.mrb[20].mxu0 %v60_v10  ;;  %389 = vmatmul.mubr.f32.gmra.mrb[20].mxu1 %v92_v11 }
  0x92   :  { %298 = vmatprep.mubr.f32.mxu0 %v63_v12  ;;  %394 = vmatprep.mubr.f32.mxu1 %v95_v13 }
  0x95   :  { %299 = vmatmul.mubr.f32.gmra.mrb[22].mxu0 %v62_v14  ;;  %395 = vmatmul.mubr.f32.gmra.mrb[22].mxu1 %v94_v15 }
  0x96   :  { %304 = vmatprep.mubr.f32.mxu0 %v65_v16  ;;  %400 = vmatprep.mubr.f32.mxu1 %v97_v17 }
  0x99   :  { %305 = vmatmul.mubr.f32.gmra.mrb[24].mxu0 %v64_v18  ;;  %401 = vmatmul.mubr.f32.gmra.mrb[24].mxu1 %v96_v19 }
  0x9a   :  { %310 = vmatprep.mubr.f32.mxu0 %v67_v20  ;;  %406 = vmatprep.mubr.f32.mxu1 %v99_v21 }
  0x9d   :  { %311 = vmatmul.mubr.f32.gmra.mrb[26].mxu0 %v66_v22  ;;  %407 = vmatmul.mubr.f32.gmra.mrb[26].mxu1 %v98_v23 }
  0x9e   :  { %316 = vmatprep.mubr.f32.mxu0 %v69_v24  ;;  %412 = vmatprep.mubr.f32.mxu1 %v101_v25 }
  0xa1   :  { %317 = vmatmul.mubr.f32.gmra.mrb[28].mxu0 %v68_v26  ;;  %413 = vmatmul.mubr.f32.gmra.mrb[28].mxu1 %v100_v27 }
  0xa2   :  { %322 = vmatprep.mubr.f32.mxu0 %v71_v28  ;;  %418 = vmatprep.mubr.f32.mxu1 %v103_v29 }
  0xa5   :  { %323 = vmatmul.mubr.f32.gmra.mrb[30].mxu0 %v70_v30  ;;  %419 = vmatmul.mubr.f32.gmra.mrb[30].mxu1 %v102_v31 }
 0x13c   :  { %v234_v32 = vpop.f32.mrb[0].mxu0  ;;  %v330_v33 = vpop.f32.mrb[0].mxu1 }
 0x13d   :  { %425 = vst [vmem:[#allocation7] sm:$0xff] %v234_v32  ;;  %490 = vst [vmem:[#allocation7 + $0x200] sm:$0xff] %v234_v32  ;;  %v236_v34 = vpop.f32.mrb[1].mxu0  ;;  %v332_v35 = vpop.f32.mrb[1].mxu1 }
 0x13e   :  { %457 = vst [vmem:[#allocation7 + $0x100] sm:$0xff] %v330_v33  ;;  %522 = vst [vmem:[#allocation7 + $0x300] sm:$0xff] %v330_v33 }
 0x13f   :  { %426 = vst [vmem:[#allocation7 + $0x8] sm:$0xff] %v236_v34  ;;  %491 = vst [vmem:[#allocation7 + $0x208] sm:$0xff] %v236_v34 }
 0x140   :  { %458 = vst [vmem:[#allocation7 + $0x108] sm:$0xff] %v332_v35  ;;  %523 = vst [vmem:[#allocation7 + $0x308] sm:$0xff] %v332_v35  ;;  %v240_v36 = vpop.f32.mrb[2].mxu0  ;;  %v336_v37 = vpop.f32.mrb[2].mxu1 }
 0x141   :  { %427 = vst [vmem:[#allocation7 + $0x10] sm:$0xff] %v240_v36  ;;  %492 = vst [vmem:[#allocation7 + $0x210] sm:$0xff] %v240_v36  ;;  %v242_v38 = vpop.f32.mrb[3].mxu0  ;;  %v338_v39 = vpop.f32.mrb[3].mxu1 }
 0x142   :  { %459 = vst [vmem:[#allocation7 + $0x110] sm:$0xff] %v336_v37  ;;  %524 = vst [vmem:[#allocation7 + $0x310] sm:$0xff] %v336_v37 }
 0x143   :  { %428 = vst [vmem:[#allocation7 + $0x18] sm:$0xff] %v242_v38  ;;  %493 = vst [vmem:[#allocation7 + $0x218] sm:$0xff] %v242_v38 }
 0x144   :  { %460 = vst [vmem:[#allocation7 + $0x118] sm:$0xff] %v338_v39  ;;  %525 = vst [vmem:[#allocation7 + $0x318] sm:$0xff] %v338_v39  ;;  %v246_v40 = vpop.f32.mrb[4].mxu0  ;;  %v342_v41 = vpop.f32.mrb[4].mxu1 }
 0x145   :  { %429 = vst [vmem:[#allocation7 + $0x20] sm:$0xff] %v246_v40  ;;  %494 = vst [vmem:[#allocation7 + $0x220] sm:$0xff] %v246_v40  ;;  %v248_v42 = vpop.f32.mrb[5].mxu0  ;;  %v344_v43 = vpop.f32.mrb[5].mxu1 }
 0x146   :  { %461 = vst [vmem:[#allocation7 + $0x120] sm:$0xff] %v342_v41  ;;  %526 = vst [vmem:[#allocation7 + $0x320] sm:$0xff] %v342_v41 }
 0x147   :  { %430 = vst [vmem:[#allocation7 + $0x28] sm:$0xff] %v248_v42  ;;  %495 = vst [vmem:[#allocation7 + $0x228] sm:$0xff] %v248_v42 }
 0x148   :  { %462 = vst [vmem:[#allocation7 + $0x128] sm:$0xff] %v344_v43  ;;  %527 = vst [vmem:[#allocation7 + $0x328] sm:$0xff] %v344_v43  ;;  %v252_v44 = vpop.f32.mrb[6].mxu0  ;;  %v348_v45 = vpop.f32.mrb[6].mxu1 }
 0x149   :  { %431 = vst [vmem:[#allocation7 + $0x30] sm:$0xff] %v252_v44  ;;  %496 = vst [vmem:[#allocation7 + $0x230] sm:$0xff] %v252_v44  ;;  %v254_v46 = vpop.f32.mrb[7].mxu0  ;;  %v350_v47 = vpop.f32.mrb[7].mxu1 }
 0x14a   :  { %463 = vst [vmem:[#allocation7 + $0x130] sm:$0xff] %v348_v45  ;;  %528 = vst [vmem:[#allocation7 + $0x330] sm:$0xff] %v348_v45 }
 0x14b   :  { %432 = vst [vmem:[#allocation7 + $0x38] sm:$0xff] %v254_v46  ;;  %497 = vst [vmem:[#allocation7 + $0x238] sm:$0xff] %v254_v46 }
 0x14c   :  { %464 = vst [vmem:[#allocation7 + $0x138] sm:$0xff] %v350_v47  ;;  %529 = vst [vmem:[#allocation7 + $0x338] sm:$0xff] %v350_v47  ;;  %v258_v48 = vpop.f32.mrb[8].mxu0  ;;  %v354_v49 = vpop.f32.mrb[8].mxu1 }
 0x14d   :  { %433 = vst [vmem:[#allocation7 + $0x40] sm:$0xff] %v258_v48  ;;  %498 = vst [vmem:[#allocation7 + $0x240] sm:$0xff] %v258_v48  ;;  %v260_v50 = vpop.f32.mrb[9].mxu0  ;;  %v356_v51 = vpop.f32.mrb[9].mxu1 }
 0x14e   :  { %465 = vst [vmem:[#allocation7 + $0x140] sm:$0xff] %v354_v49  ;;  %530 = vst [vmem:[#allocation7 + $0x340] sm:$0xff] %v354_v49 }
 0x14f   :  { %434 = vst [vmem:[#allocation7 + $0x48] sm:$0xff] %v260_v50  ;;  %499 = vst [vmem:[#allocation7 + $0x248] sm:$0xff] %v260_v50 }
 0x150   :  { %466 = vst [vmem:[#allocation7 + $0x148] sm:$0xff] %v356_v51  ;;  %531 = vst [vmem:[#allocation7 + $0x348] sm:$0xff] %v356_v51  ;;  %v264_v52 = vpop.f32.mrb[10].mxu0  ;;  %v360_v53 = vpop.f32.mrb[10].mxu1 }
 0x151   :  { %435 = vst [vmem:[#allocation7 + $0x50] sm:$0xff] %v264_v52  ;;  %500 = vst [vmem:[#allocation7 + $0x250] sm:$0xff] %v264_v52  ;;  %v266_v54 = vpop.f32.mrb[11].mxu0  ;;  %v362_v55 = vpop.f32.mrb[11].mxu1 }
 0x152   :  { %467 = vst [vmem:[#allocation7 + $0x150] sm:$0xff] %v360_v53  ;;  %532 = vst [vmem:[#allocation7 + $0x350] sm:$0xff] %v360_v53 }
 0x153   :  { %436 = vst [vmem:[#allocation7 + $0x58] sm:$0xff] %v266_v54  ;;  %501 = vst [vmem:[#allocation7 + $0x258] sm:$0xff] %v266_v54 }
 0x154   :  { %468 = vst [vmem:[#allocation7 + $0x158] sm:$0xff] %v362_v55  ;;  %533 = vst [vmem:[#allocation7 + $0x358] sm:$0xff] %v362_v55  ;;  %v270_v56 = vpop.f32.mrb[12].mxu0  ;;  %v366_v57 = vpop.f32.mrb[12].mxu1 }
 0x155   :  { %437 = vst [vmem:[#allocation7 + $0x60] sm:$0xff] %v270_v56  ;;  %502 = vst [vmem:[#allocation7 + $0x260] sm:$0xff] %v270_v56  ;;  %v272_v58 = vpop.f32.mrb[13].mxu0  ;;  %v368_v59 = vpop.f32.mrb[13].mxu1 }
 0x156   :  { %469 = vst [vmem:[#allocation7 + $0x160] sm:$0xff] %v366_v57  ;;  %534 = vst [vmem:[#allocation7 + $0x360] sm:$0xff] %v366_v57 }
 0x157   :  { %438 = vst [vmem:[#allocation7 + $0x68] sm:$0xff] %v272_v58  ;;  %503 = vst [vmem:[#allocation7 + $0x268] sm:$0xff] %v272_v58 }
 0x158   :  { %470 = vst [vmem:[#allocation7 + $0x168] sm:$0xff] %v368_v59  ;;  %535 = vst [vmem:[#allocation7 + $0x368] sm:$0xff] %v368_v59  ;;  %v276_v60 = vpop.f32.mrb[14].mxu0  ;;  %v372_v61 = vpop.f32.mrb[14].mxu1 }
 0x159   :  { %439 = vst [vmem:[#allocation7 + $0x70] sm:$0xff] %v276_v60  ;;  %504 = vst [vmem:[#allocation7 + $0x270] sm:$0xff] %v276_v60  ;;  %v278_v62 = vpop.f32.mrb[15].mxu0  ;;  %v374_v63 = vpop.f32.mrb[15].mxu1 }
 0x15a   :  { %471 = vst [vmem:[#allocation7 + $0x170] sm:$0xff] %v372_v61  ;;  %536 = vst [vmem:[#allocation7 + $0x370] sm:$0xff] %v372_v61 }
 0x15b   :  { %440 = vst [vmem:[#allocation7 + $0x78] sm:$0xff] %v278_v62  ;;  %505 = vst [vmem:[#allocation7 + $0x278] sm:$0xff] %v278_v62 }
 0x15c   :  { %472 = vst [vmem:[#allocation7 + $0x178] sm:$0xff] %v374_v63  ;;  %537 = vst [vmem:[#allocation7 + $0x378] sm:$0xff] %v374_v63  ;;  %v282_v0 = vpop.f32.mrb[16].mxu0  ;;  %v378_v1 = vpop.f32.mrb[16].mxu1 }
 0x15d   :  { %441 = vst [vmem:[#allocation7 + $0x80] sm:$0xff] %v282_v0  ;;  %506 = vst [vmem:[#allocation7 + $0x280] sm:$0xff] %v282_v0  ;;  %v284_v2 = vpop.f32.mrb[17].mxu0  ;;  %v380_v3 = vpop.f32.mrb[17].mxu1 }
 0x15e   :  { %473 = vst [vmem:[#allocation7 + $0x180] sm:$0xff] %v378_v1  ;;  %538 = vst [vmem:[#allocation7 + $0x380] sm:$0xff] %v378_v1 }
 0x15f   :  { %442 = vst [vmem:[#allocation7 + $0x88] sm:$0xff] %v284_v2  ;;  %507 = vst [vmem:[#allocation7 + $0x288] sm:$0xff] %v284_v2 }
 0x160   :  { %474 = vst [vmem:[#allocation7 + $0x188] sm:$0xff] %v380_v3  ;;  %539 = vst [vmem:[#allocation7 + $0x388] sm:$0xff] %v380_v3  ;;  %v288_v4 = vpop.f32.mrb[18].mxu0  ;;  %v384_v5 = vpop.f32.mrb[18].mxu1 }
 0x161   :  { %443 = vst [vmem:[#allocation7 + $0x90] sm:$0xff] %v288_v4  ;;  %508 = vst [vmem:[#allocation7 + $0x290] sm:$0xff] %v288_v4  ;;  %v290_v6 = vpop.f32.mrb[19].mxu0  ;;  %v386_v7 = vpop.f32.mrb[19].mxu1 }
 0x162   :  { %475 = vst [vmem:[#allocation7 + $0x190] sm:$0xff] %v384_v5  ;;  %540 = vst [vmem:[#allocation7 + $0x390] sm:$0xff] %v384_v5 }
 0x163   :  { %444 = vst [vmem:[#allocation7 + $0x98] sm:$0xff] %v290_v6  ;;  %509 = vst [vmem:[#allocation7 + $0x298] sm:$0xff] %v290_v6 }
 0x164   :  { %476 = vst [vmem:[#allocation7 + $0x198] sm:$0xff] %v386_v7  ;;  %541 = vst [vmem:[#allocation7 + $0x398] sm:$0xff] %v386_v7  ;;  %v294_v8 = vpop.f32.mrb[20].mxu0  ;;  %v390_v9 = vpop.f32.mrb[20].mxu1 }
 0x165   :  { %445 = vst [vmem:[#allocation7 + $0xa0] sm:$0xff] %v294_v8  ;;  %510 = vst [vmem:[#allocation7 + $0x2a0] sm:$0xff] %v294_v8  ;;  %v296_v10 = vpop.f32.mrb[21].mxu0  ;;  %v392_v11 = vpop.f32.mrb[21].mxu1 }
 0x166   :  { %477 = vst [vmem:[#allocation7 + $0x1a0] sm:$0xff] %v390_v9  ;;  %542 = vst [vmem:[#allocation7 + $0x3a0] sm:$0xff] %v390_v9 }
 0x167   :  { %446 = vst [vmem:[#allocation7 + $0xa8] sm:$0xff] %v296_v10  ;;  %511 = vst [vmem:[#allocation7 + $0x2a8] sm:$0xff] %v296_v10 }
 0x168   :  { %478 = vst [vmem:[#allocation7 + $0x1a8] sm:$0xff] %v392_v11  ;;  %543 = vst [vmem:[#allocation7 + $0x3a8] sm:$0xff] %v392_v11  ;;  %v300_v12 = vpop.f32.mrb[22].mxu0  ;;  %v396_v13 = vpop.f32.mrb[22].mxu1 }
 0x169   :  { %447 = vst [vmem:[#allocation7 + $0xb0] sm:$0xff] %v300_v12  ;;  %512 = vst [vmem:[#allocation7 + $0x2b0] sm:$0xff] %v300_v12  ;;  %v302_v14 = vpop.f32.mrb[23].mxu0  ;;  %v398_v15 = vpop.f32.mrb[23].mxu1 }
 0x16a   :  { %479 = vst [vmem:[#allocation7 + $0x1b0] sm:$0xff] %v396_v13  ;;  %544 = vst [vmem:[#allocation7 + $0x3b0] sm:$0xff] %v396_v13 }
 0x16b   :  { %448 = vst [vmem:[#allocation7 + $0xb8] sm:$0xff] %v302_v14  ;;  %513 = vst [vmem:[#allocation7 + $0x2b8] sm:$0xff] %v302_v14 }
 0x16c   :  { %480 = vst [vmem:[#allocation7 + $0x1b8] sm:$0xff] %v398_v15  ;;  %545 = vst [vmem:[#allocation7 + $0x3b8] sm:$0xff] %v398_v15  ;;  %v306_v16 = vpop.f32.mrb[24].mxu0  ;;  %v402_v17 = vpop.f32.mrb[24].mxu1 }
 0x16d   :  { %449 = vst [vmem:[#allocation7 + $0xc0] sm:$0xff] %v306_v16  ;;  %514 = vst [vmem:[#allocation7 + $0x2c0] sm:$0xff] %v306_v16  ;;  %v308_v18 = vpop.f32.mrb[25].mxu0  ;;  %v404_v19 = vpop.f32.mrb[25].mxu1 }
 0x16e   :  { %481 = vst [vmem:[#allocation7 + $0x1c0] sm:$0xff] %v402_v17  ;;  %546 = vst [vmem:[#allocation7 + $0x3c0] sm:$0xff] %v402_v17 }
 0x16f   :  { %450 = vst [vmem:[#allocation7 + $0xc8] sm:$0xff] %v308_v18  ;;  %515 = vst [vmem:[#allocation7 + $0x2c8] sm:$0xff] %v308_v18 }
 0x170   :  { %482 = vst [vmem:[#allocation7 + $0x1c8] sm:$0xff] %v404_v19  ;;  %547 = vst [vmem:[#allocation7 + $0x3c8] sm:$0xff] %v404_v19  ;;  %v312_v20 = vpop.f32.mrb[26].mxu0  ;;  %v408_v21 = vpop.f32.mrb[26].mxu1 }
 0x171   :  { %451 = vst [vmem:[#allocation7 + $0xd0] sm:$0xff] %v312_v20  ;;  %516 = vst [vmem:[#allocation7 + $0x2d0] sm:$0xff] %v312_v20  ;;  %v314_v22 = vpop.f32.mrb[27].mxu0  ;;  %v410_v23 = vpop.f32.mrb[27].mxu1 }
 0x172   :  { %483 = vst [vmem:[#allocation7 + $0x1d0] sm:$0xff] %v408_v21  ;;  %548 = vst [vmem:[#allocation7 + $0x3d0] sm:$0xff] %v408_v21 }
 0x173   :  { %452 = vst [vmem:[#allocation7 + $0xd8] sm:$0xff] %v314_v22  ;;  %517 = vst [vmem:[#allocation7 + $0x2d8] sm:$0xff] %v314_v22 }
 0x174   :  { %484 = vst [vmem:[#allocation7 + $0x1d8] sm:$0xff] %v410_v23  ;;  %549 = vst [vmem:[#allocation7 + $0x3d8] sm:$0xff] %v410_v23  ;;  %v318_v24 = vpop.f32.mrb[28].mxu0  ;;  %v414_v25 = vpop.f32.mrb[28].mxu1 }
 0x175   :  { %453 = vst [vmem:[#allocation7 + $0xe0] sm:$0xff] %v318_v24  ;;  %518 = vst [vmem:[#allocation7 + $0x2e0] sm:$0xff] %v318_v24  ;;  %v320_v26 = vpop.f32.mrb[29].mxu0  ;;  %v416_v27 = vpop.f32.mrb[29].mxu1 }
 0x176   :  { %485 = vst [vmem:[#allocation7 + $0x1e0] sm:$0xff] %v414_v25  ;;  %550 = vst [vmem:[#allocation7 + $0x3e0] sm:$0xff] %v414_v25 }
 0x177   :  { %454 = vst [vmem:[#allocation7 + $0xe8] sm:$0xff] %v320_v26  ;;  %519 = vst [vmem:[#allocation7 + $0x2e8] sm:$0xff] %v320_v26 }
 0x178   :  { %486 = vst [vmem:[#allocation7 + $0x1e8] sm:$0xff] %v416_v27  ;;  %551 = vst [vmem:[#allocation7 + $0x3e8] sm:$0xff] %v416_v27  ;;  %v324_v28 = vpop.f32.mrb[30].mxu0  ;;  %v420_v29 = vpop.f32.mrb[30].mxu1 }
 0x179   :  { %455 = vst [vmem:[#allocation7 + $0xf0] sm:$0xff] %v324_v28  ;;  %520 = vst [vmem:[#allocation7 + $0x2f0] sm:$0xff] %v324_v28  ;;  %v326_v30 = vpop.f32.mrb[31].mxu0  ;;  %v422_v31 = vpop.f32.mrb[31].mxu1 }
 0x17a   :  { %487 = vst [vmem:[#allocation7 + $0x1f0] sm:$0xff] %v420_v29  ;;  %552 = vst [vmem:[#allocation7 + $0x3f0] sm:$0xff] %v420_v29 }
 0x17b   :  { %456 = vst [vmem:[#allocation7 + $0xf8] sm:$0xff] %v326_v30  ;;  %521 = vst [vmem:[#allocation7 + $0x2f8] sm:$0xff] %v326_v30 }
 0x17c   :  { %488 = vst [vmem:[#allocation7 + $0x1f8] sm:$0xff] %v422_v31  ;;  %553 = vst [vmem:[#allocation7 + $0x3f8] sm:$0xff] %v422_v31 }
 0x17d   :  { %728 = shalt.err (!%p725_p6)
}
 0x17e   :  { %s729_s10 = scalar_lea.hbm %s812_s2, 16384 }
 0x17f   :  { %p730_p7 = scmp.ne.s32.totalorder %s812_s2, %s729_s10  ;;  %p733_p8 = scmp.lt.u32.totalorder %s729_s10, %s812_s2 }
 0x181   :  { %p735_p9 = pnand %p733_p8, %p730_p7 }
 0x183   :  { %738 = shalt.err (!%p735_p9)
}
 0x184   :  { %565 = dma.vmem_to_hbm [thread:$0]  %s560_s6, 16384, %s812_s2, [#allocation4], %s746_s19, %s746_s19, %s747_s20  }
 0x185   :  { %743 = dma.done.wait [#allocation4], 16384  }
 0x186   :  { %744 = vsyncadd [#allocation4], 4294950912 }
 0x187   :  { %569 = vsyncpa [#allocation3], 1 }
 0x188   :  { %570 = vsyncpa [#allocation6], 1 }
 0x189   :  { %571 = vsyncpa [#allocation4], 1 }

</bundles_post_ra>
